<compile_context>
chip_gen: v7x
topology: tpu7x:2x2x1
jax: 0.10.0
libtpu: 0.0.40
codegen_flags: <defaults>
</compile_context>

<pallas_src>
import functools

import jax
import jax.numpy as jnp
import numpy as np
from jax.experimental import pallas as pl
from jax.experimental.pallas import tpu as pltpu


def _round_up(x, m):
    return (x + m - 1) // m * m


def _pick_reps(n_time, batch, row_target):
    """reps = time steps per row block (Rb = reps * batch). Must divide n_time."""
    divs = [d for d in range(1, n_time + 1) if n_time % d == 0]
    feas = [d for d in divs if d * batch <= max(row_target, batch)]
    if not feas:
        feas = [1]
    # Prefer >= 2 row blocks so the 'parallel' row axis can feed both v7x TCs.
    pref = [d for d in feas if n_time // d >= 2]
    return max(pref) if pref else max(feas)


def _vmem_estimate(rb, vt, batch, hdim, n_w, w_isz, x_isz):
    """Rough double-buffered VMEM footprint of one grid step."""
    est = 2 * rb * hdim * w_isz              # hidden row block
    est += 2 * n_w * hdim * vt * w_isz       # W_lin^T (+ W_hid^T) vocab tiles
    est += 2 * (batch * vt + vt) * 4         # gate/pre-img tile + bias tile
    est += 2 * rb * vt * x_isz               # logits output tile
    est += 2 * rb * 4 + 2 * rb * 4           # lse output + (m, l) scratch
    return est


def _mm_generator_kernel(use_hidden, add, inv_denom, reps, batch, fused,
                         hidden_ref, gate_ref, wlin_ref, blin_ref, *rest):
    if use_hidden:
        whid_ref, x_ref, lse_ref, m_sc, l_sc = rest
    else:
        x_ref, lse_ref, m_sc, l_sc = rest

    vt = wlin_ref.shape[1]
    rb = reps * batch

    # proj = hidden @ W_lin^T + b_lin   (compute-dtype MXU inputs, f32 acc)
    proj = jnp.dot(hidden_ref[...], wlin_ref[...],
                   preferred_element_type=jnp.float32) + blin_ref[...]
    proj = proj.reshape(reps, batch, vt)

    if use_hidden:
        h2g = jnp.dot(hidden_ref[...], whid_ref[...],
                      preferred_element_type=jnp.float32)
        pre = gate_ref[...] + h2g.reshape(reps, batch, vt)   # broadcast (B,Vt)
        gate = (jax.nn.sigmoid(pre) + add) * inv_denom
    else:
        # Gate already fully computed in the wrapper: (sigmoid(.)+add)/(1+add).
        gate = gate_ref[...]                                  # (B, Vt)

    # Per-time-step replication via broadcast (no sublane concatenation).
    x = (proj * gate).reshape(rb, vt)                         # (Rb, Vt) f32

    if fused:
        # Single vocab tile: full stable log-softmax in-kernel, one write.
        m = jnp.max(x, axis=-1, keepdims=True)
        lse = m + jnp.log(jnp.sum(jnp.exp(x - m), axis=-1, keepdims=True))
        x_ref[...] = (x - lse).astype(x_ref.dtype)
        lse_ref[...] = lse
    else:
        v = pl.program_id(1)

        @pl.when(v == 0)
        def _():
            m_sc[...] = jnp.full_like(m_sc, -jnp.inf)
            l_sc[...] = jnp.zeros_like(l_sc)

        m_prev = m_sc[...]
        m_new = jnp.maximum(m_prev, jnp.max(x, axis=-1, keepdims=True))
        l_sc[...] = (l_sc[...] * jnp.exp(m_prev - m_new)
                     + jnp.sum(jnp.exp(x - m_new), axis=-1, keepdims=True))
        m_sc[...] = m_new
        x_ref[...] = x.astype(x_ref.dtype)   # unnormalized, intermediate dtype

        @pl.when(v == pl.num_programs(1) - 1)
        def _():
            lse_ref[...] = m_sc[...] + jnp.log(l_sc[...])


def multimodal_generator(hidden, img_feats, n_time, params, *,
                         add=0.0, use_hidden=False,
                         compute_dtype=jnp.bfloat16,
                         intermediate_dtype=jnp.bfloat16,
                         out_dtype=jnp.float32,
                         row_block_target=1024, v_block_target=2048,
                         vmem_budget_bytes=48 * 1024 * 1024):
    """Pallas TPU implementation of MultiModalGenerator.forward.

    hidden:    (n_time * batch, H), time-major (matches PyTorch repeat()).
    img_feats: (batch, img_feat_size).
    params:    weights pre-transposed ONCE to (in_features, V):
               w_lin_t (H, V), b_lin (V,), w_gate_t (Fi, V), b_gate (V,),
               w_hid_t (H, V) only needed when use_hidden=True.
               In production, persist them already cast to `compute_dtype`
               (and pre-padded) outside the call path; the .astype/pad below
               are then no-ops.
    intermediate_dtype: dtype of the unnormalized logits written by the
               multi-vocab-tile path (bf16 halves that HBM round-trip).
    """
    if float(add) == -1.0:
        raise ValueError("add == -1 divides by zero (same as the PyTorch ref).")

    N, H = hidden.shape
    B, _ = img_feats.shape
    assert N == n_time * B, "hidden rows must equal n_time * batch (time-major)"
    V = params["w_lin_t"].shape[1]

    cd = jnp.dtype(compute_dtype)
    od = jnp.dtype(out_dtype)
    idt = jnp.dtype(intermediate_dtype)
    inv_denom = 1.0 / (1.0 + float(add))
    n_w = 2 if use_hidden else 1

    # ---- tile selection under a per-core VMEM budget (v7x: 64 MiB/TC) ------
    vt = min(_round_up(V, 128), max(128, (v_block_target // 128) * 128))
    reps = _pick_reps(n_time, B, row_block_target)
    while True:
        rb = reps * B
        v_pad = _round_up(V, vt)
        n_v = v_pad // vt
        fused = n_v == 1
        x_isz = od.itemsize if fused else idt.itemsize
        est = _vmem_estimate(rb, vt, B, H, n_w, cd.itemsize, x_isz)
        if est <= vmem_budget_bytes:
            break
        if vt > 128:
            vt = max(128, (vt // 2) // 128 * 128)
        elif reps > 1:
            smaller = [d for d in range(1, reps) if n_time % d == 0]
            reps = max(smaller) if smaller else 1
        else:
            break   # smallest tiles already; let the compiler try anyway
    if rb % 8 != 0 and rb != N:
        # TODO(synk): support batch sizes that are not a multiple of 8 without
        # falling back to a single full-extent row block.
        reps, rb = n_time, N
    n_row_blocks = N // rb
    pad = v_pad - V
    est = _vmem_estimate(rb, vt, B, H, n_w, cd.itemsize, x_isz)
    vmem_limit = int(min(128 * 1024 * 1024, max(32 * 1024 * 1024, est * 1.5)))

    # ---- weights: cast + pad ragged vocab to a multiple of the tile --------
    hidden_c = hidden.astype(cd)
    wlin_t = params["w_lin_t"].astype(cd)
    blin = params["b_lin"].astype(jnp.float32)
    wgate_t = params["w_gate_t"].astype(cd)
    bgate = params["b_gate"].astype(jnp.float32)
    if pad:
        wlin_t = jnp.pad(wlin_t, ((0, 0), (0, pad)))
        # -1e30 bias keeps padded vocab columns out of max / sum-exp.
        blin = jnp.pad(blin, (0, pad), constant_values=-1e30)
        wgate_t = jnp.pad(wgate_t, ((0, 0), (0, pad)))
        # +40 -> sigmoid == 1.0 exactly -> padded gate == 1 for any add > -1.
        bgate = jnp.pad(bgate, (0, pad), constant_values=40.0)
    blin2d = blin.reshape(1, v_pad)

    # Time-invariant image gate pre-activation, hoisted out of the kernel:
    # one tiny (B, V) matmul instead of one per row block / vocab tile.
    pre_img = (jnp.dot(img_feats.astype(cd), wgate_t,
                       preferred_element_type=jnp.float32) + bgate[None, :])
    if use_hidden:
        gate_in = pre_img                                   # sigmoid in-kernel
    else:
        # Fully hoisted gate: one (B, V) elementwise pass in the wrapper.
        gate_in = (jax.nn.sigmoid(pre_img) + add) * inv_denom

    inputs = [hidden_c, gate_in, wlin_t, blin2d]
    in_specs = [
        pl.BlockSpec((rb, H), lambda r, v: (r, 0)),    # hidden row block
        pl.BlockSpec((B, vt), lambda r, v: (0, v)),    # gate / pre-activation
        pl.BlockSpec((H, vt), lambda r, v: (0, v)),    # W_lin^T vocab tile
        pl.BlockSpec((1, vt), lambda r, v: (0, v)),    # b_lin vocab tile
    ]
    if use_hidden:
        whid_t = params["w_hid_t"].astype(cd)
        if pad:
            whid_t = jnp.pad(whid_t, ((0, 0), (0, pad)))
        inputs.append(whid_t)                          # only passed when used
        in_specs.append(pl.BlockSpec((H, vt), lambda r, v: (0, v)))

    x_dtype = od if fused else idt
    out_shape = (jax.ShapeDtypeStruct((N, v_pad), x_dtype),
                 jax.ShapeDtypeStruct((N, 1), jnp.float32))
    out_specs = [pl.BlockSpec((rb, vt), lambda r, v: (r, v)),
                 pl.BlockSpec((rb, 1), lambda r, v: (r, 0))]

    kernel = functools.partial(_mm_generator_kernel, use_hidden, float(add),
                               inv_denom, reps, B, fused)

    x, lse = pl.pallas_call(
        kernel,
        out_shape=out_shape,
        grid_spec=pltpu.PrefetchScalarGridSpec(
            num_scalar_prefetch=0,
            grid=(n_row_blocks, n_v),
            in_specs=in_specs,
            out_specs=out_specs,
            scratch_shapes=[pltpu.VMEM((rb, 1), jnp.float32),   # running max
                            pltpu.VMEM((rb, 1), jnp.float32)]), # running sumexp
        compiler_params=pltpu.CompilerParams(
            dimension_semantics=("parallel", "arbitrary"),
            vmem_limit_bytes=vmem_limit),
    )(*inputs)

    if pad:
        x = x[:, :V]
    if fused:
        return x
    # Cheap broadcast subtraction finishes log-softmax across vocab tiles
    # (x is bf16 by default, halving this round-trip vs the previous f32).
    return (x.astype(jnp.float32) - lse).astype(od)


def multimodal_generator_ref(hidden, img_feats, n_time, params, *,
                             add=0.0, use_hidden=False):
    """Pure-JAX (f32) reference mirroring the PyTorch forward."""
    proj = hidden @ params["w_lin"].T + params["b_lin"]
    pre = img_feats @ params["w_gate"].T + params["b_gate"]
    if use_hidden:
        pre = jnp.tile(pre, (n_time, 1)) + hidden @ params["w_hid"].T
        gate = jax.nn.sigmoid(pre) + add
    else:
        gate = jax.nn.sigmoid(pre) + add
        gate = jnp.tile(gate, (n_time, 1))
    gate = gate / (1.0 + add)
    return jax.nn.log_softmax(proj * gate, axis=-1)


if __name__ == "__main__":
    # Small shapes consistent with the module:
    #   batch=8, n_time=4, hidden_size=32, img_feat_size=32, vocab=256
    B, T, H, Fi, V = 8, 4, 32, 32, 256
    N = B * T

    key = jax.random.PRNGKey(0)
    ks = jax.random.split(key, 6)
    hidden = jax.random.normal(ks[0], (N, H), jnp.float32)
    img_feats = jax.random.normal(ks[1], (B, Fi), jnp.float32)

    w_lin = 0.1 * jax.random.normal(ks[2], (V, H), jnp.float32)
    b_lin = 0.1 * jax.random.normal(ks[3], (V,), jnp.float32)
    w_gate = 0.1 * jax.random.normal(ks[4], (V, Fi), jnp.float32)
    b_gate = jnp.ones((V,), jnp.float32)          # gate bias init = 1.0
    w_hid = 0.1 * jax.random.normal(ks[5], (V, H), jnp.float32)

    def make_params(v):
        p = {"w_lin_t": w_lin[:v].T, "b_lin": b_lin[:v],
             "w_gate_t": w_gate[:v].T, "b_gate": b_gate[:v],
             "w_hid_t": w_hid[:v].T}
        r = {"w_lin": w_lin[:v], "b_lin": b_lin[:v], "w_gate": w_gate[:v],
             "b_gate": b_gate[:v], "w_hid": w_hid[:v]}
        return p, r

    params_full, ref_full = make_params(V)
    params_rag, ref_rag = make_params(200)   # ragged vocab -> exercises padding

    configs = [
        # Multi-vocab-tile online-logsumexp path, f32 (tight tolerance).
        (params_full, ref_full,
         dict(use_hidden=True, add=0.0, compute_dtype=jnp.float32,
              intermediate_dtype=jnp.float32,
              row_block_target=16, v_block_target=128), 1e-4),
        # Fused single-vocab-tile path, f32.
        (params_full, ref_full,
         dict(use_hidden=False, add=1.0, compute_dtype=jnp.float32,
              row_block_target=1024, v_block_target=2048), 1e-4),
        # Ragged vocab (V=200 -> padded to 256), online-lse path, f32.
        (params_rag, ref_rag,
         dict(use_hidden=True, add=0.5, compute_dtype=jnp.float32,
              intermediate_dtype=jnp.float32,
              row_block_target=32, v_block_target=128), 1e-4),
        # bf16 MXU inputs + bf16 unnormalized intermediate (looser tolerance).
        (params_full, ref_full,
         dict(use_hidden=True, add=0.5, compute_dtype=jnp.bfloat16,
              row_block_target=16, v_block_target=128), 3e-2),
        (params_full, ref_full,
         dict(use_hidden=False, add=0.0, compute_dtype=jnp.bfloat16,
              row_block_target=1024, v_block_target=2048), 3e-2),
    ]

    ok = True
    for p, rp, cfg, tol in configs:
        out = jax.block_until_ready(
            multimodal_generator(hidden, img_feats, T, p, **cfg))
        ref = multimodal_generator_ref(hidden, img_feats, T, rp,
                                       add=cfg["add"],
                                       use_hidden=cfg["use_hidden"])
        out_np = np.asarray(out, dtype=np.float32)
        ref_np = np.asarray(ref, dtype=np.float32)
        if not np.allclose(out_np, ref_np, atol=tol, rtol=tol):
            ok = False
            print(f"MISMATCH cfg={cfg} "
                  f"max_err={np.max(np.abs(out_np - ref_np)):.3e}")

    if ok:
        print("KERNEL_OK")
</pallas_src>

<mosaic_0001>
module attributes {stable_mosaic.version = 11 : i64} {
  func.func @_mm_generator_kernel(%arg0: i32, %arg1: i32, %arg2: memref<16x32xf32, #tpu.memory_space<vmem>>, %arg3: memref<8x128xf32, #tpu.memory_space<vmem>>, %arg4: memref<32x128xf32, #tpu.memory_space<vmem>>, %arg5: memref<1x128xf32, #tpu.memory_space<vmem>>, %arg6: memref<32x128xf32, #tpu.memory_space<vmem>>, %arg7: memref<16x128xf32, #tpu.memory_space<vmem>>, %arg8: memref<16x1xf32, #tpu.memory_space<vmem>>, %arg9: memref<16x1xf32, #tpu.memory_space<vmem>>, %arg10: memref<16x1xf32, #tpu.memory_space<vmem>>) attributes {dimension_semantics = [#tpu.dimension_semantics<parallel>, #tpu.dimension_semantics<arbitrary>], iteration_bounds = array<i64: 2, 2>, scalar_prefetch = 0 : i64, scratch_operands = 2 : i64, tpu.core_type = #tpu.core_type<tc>, window_params = [{transform_indices = @transform_0, window_bounds = array<i64: 16, 32>}, {transform_indices = @transform_1, window_bounds = array<i64: 8, 128>}, {transform_indices = @transform_2, window_bounds = array<i64: 32, 128>}, {transform_indices = @transform_3, window_bounds = array<i64: 1, 128>}, {transform_indices = @transform_4, window_bounds = array<i64: 32, 128>}, {transform_indices = @transform_5, window_bounds = array<i64: 16, 128>}, {transform_indices = @transform_6, window_bounds = array<i64: 16, 1>}]} {
    %c0 = arith.constant 0 : index
    %c0_0 = arith.constant 0 : index
    %0 = vector.load %arg2[%c0, %c0_0] : memref<16x32xf32, #tpu.memory_space<vmem>>, vector<16x32xf32>
    %c0_1 = arith.constant 0 : index
    %c0_2 = arith.constant 0 : index
    %1 = vector.load %arg4[%c0_1, %c0_2] : memref<32x128xf32, #tpu.memory_space<vmem>>, vector<32x128xf32>
    %cst = arith.constant dense<0.000000e+00> : vector<16x128xf32>
    %2 = tpu.matmul %0, %1, %cst {dimension_numbers = #tpu.dot_dimension_numbers<[1], [0], [0], [1], [0, 0, 1, 1], [], []>} : vector<16x32xf32>, vector<32x128xf32>, vector<16x128xf32> -> vector<16x128xf32>
    %c0_3 = arith.constant 0 : index
    %c0_4 = arith.constant 0 : index
    %3 = vector.load %arg5[%c0_3, %c0_4] : memref<1x128xf32, #tpu.memory_space<vmem>>, vector<1x128xf32>
    %4 = vector.broadcast %3 : vector<1x128xf32> to vector<16x128xf32>
    %5 = arith.addf %2, %4 : vector<16x128xf32>
    %6 = vector.shape_cast %5 : vector<16x128xf32> to vector<2x8x128xf32>
    %c0_5 = arith.constant 0 : index
    %c0_6 = arith.constant 0 : index
    %7 = vector.load %arg2[%c0_5, %c0_6] : memref<16x32xf32, #tpu.memory_space<vmem>>, vector<16x32xf32>
    %c0_7 = arith.constant 0 : index
    %c0_8 = arith.constant 0 : index
    %8 = vector.load %arg6[%c0_7, %c0_8] : memref<32x128xf32, #tpu.memory_space<vmem>>, vector<32x128xf32>
    %cst_9 = arith.constant dense<0.000000e+00> : vector<16x128xf32>
    %9 = tpu.matmul %7, %8, %cst_9 {dimension_numbers = #tpu.dot_dimension_numbers<[1], [0], [0], [1], [0, 0, 1, 1], [], []>} : vector<16x32xf32>, vector<32x128xf32>, vector<16x128xf32> -> vector<16x128xf32>
    %c0_10 = arith.constant 0 : index
    %c0_11 = arith.constant 0 : index
    %10 = vector.load %arg3[%c0_10, %c0_11] : memref<8x128xf32, #tpu.memory_space<vmem>>, vector<8x128xf32>
    %11 = vector.shape_cast %9 : vector<16x128xf32> to vector<2x8x128xf32>
    %12 = vector.shape_cast %10 : vector<8x128xf32> to vector<1x8x128xf32>
    %13 = vector.broadcast %12 : vector<1x8x128xf32> to vector<2x8x128xf32>
    %14 = arith.addf %13, %11 : vector<2x8x128xf32>
    %15 = arith.negf %14 : vector<2x8x128xf32>
    %16 = math.exp %15 : vector<2x8x128xf32>
    %cst_12 = arith.constant 1.000000e+00 : f32
    %17 = vector.broadcast %cst_12 : f32 to vector<2x8x128xf32>
    %18 = arith.addf %17, %16 : vector<2x8x128xf32>
    %19 = arith.divf %17, %18 : vector<2x8x128xf32>
    %cst_13 = arith.constant 0.000000e+00 : f32
    %20 = vector.broadcast %cst_13 : f32 to vector<2x8x128xf32>
    %21 = arith.addf %19, %20 : vector<2x8x128xf32>
    %cst_14 = arith.constant 1.000000e+00 : f32
    %22 = vector.broadcast %cst_14 : f32 to vector<2x8x128xf32>
    %23 = arith.mulf %21, %22 : vector<2x8x128xf32>
    %24 = arith.mulf %6, %23 : vector<2x8x128xf32>
    %25 = vector.shape_cast %24 : vector<2x8x128xf32> to vector<16x128xf32>
    %c0_i32 = arith.constant 0 : i32
    %26 = arith.cmpi eq, %arg1, %c0_i32 : i32
    %27 = arith.extui %26 : i1 to i32
    %c0_i32_15 = arith.constant 0 : i32
    %28 = arith.cmpi ne, %27, %c0_i32_15 : i32
    scf.if %28 {
      %cst_29 = arith.constant 0xFF800000 : f32
      %49 = vector.broadcast %cst_29 : f32 to vector<16x1xf32>
      %c0_30 = arith.constant 0 : index
      %c0_31 = arith.constant 0 : index
      %50 = vector.load %arg9[%c0_30, %c0_31] : memref<16x1xf32, #tpu.memory_space<vmem>>, vector<16x1xf32>
      tpu.vector_store %arg9[%c0_30, %c0_31], %49 {strides = array<i32>} : memref<16x1xf32, #tpu.memory_space<vmem>>, vector<16x1xf32>,
      %cst_32 = arith.constant 0.000000e+00 : f32
      %51 = vector.broadcast %cst_32 : f32 to vector<16x1xf32>
      %c0_33 = arith.constant 0 : index
      %c0_34 = arith.constant 0 : index
      %52 = vector.load %arg10[%c0_33, %c0_34] : memref<16x1xf32, #tpu.memory_space<vmem>>, vector<16x1xf32>
      tpu.vector_store %arg10[%c0_33, %c0_34], %51 {strides = array<i32>} : memref<16x1xf32, #tpu.memory_space<vmem>>, vector<16x1xf32>,
    } else {
    }
    %c0_16 = arith.constant 0 : index
    %c0_17 = arith.constant 0 : index
    %29 = vector.load %arg9[%c0_16, %c0_17] : memref<16x1xf32, #tpu.memory_space<vmem>>, vector<16x1xf32>
    %cst_18 = arith.constant dense<0xFF800000> : vector<16xf32>
    %30 = vector.multi_reduction <maximumf>, %25, %cst_18 [1] : vector<16x128xf32> to vector<16xf32>
    %31 = vector.shape_cast %30 : vector<16xf32> to vector<16x1xf32>
    %32 = arith.maximumf %29, %31 : vector<16x1xf32>
    %c0_19 = arith.constant 0 : index
    %c0_20 = arith.constant 0 : index
    %33 = vector.load %arg10[%c0_19, %c0_20] : memref<16x1xf32, #tpu.memory_space<vmem>>, vector<16x1xf32>
    %34 = arith.subf %29, %32 : vector<16x1xf32>
    %35 = math.exp %34 : vector<16x1xf32>
    %36 = arith.mulf %33, %35 : vector<16x1xf32>
    %37 = vector.broadcast %32 : vector<16x1xf32> to vector<16x128xf32>
    %38 = arith.subf %25, %37 : vector<16x128xf32>
    %39 = math.exp %38 : vector<16x128xf32>
    %cst_21 = arith.constant dense<0.000000e+00> : vector<16xf32>
    %40 = vector.multi_reduction <add>, %39, %cst_21 [1] : vector<16x128xf32> to vector<16xf32>
    %41 = vector.shape_cast %40 : vector<16xf32> to vector<16x1xf32>
    %42 = arith.addf %36, %41 : vector<16x1xf32>
    %c0_22 = arith.constant 0 : index
    %c0_23 = arith.constant 0 : index
    %43 = vector.load %arg10[%c0_22, %c0_23] : memref<16x1xf32, #tpu.memory_space<vmem>>, vector<16x1xf32>
    tpu.vector_store %arg10[%c0_22, %c0_23], %42 {strides = array<i32>} : memref<16x1xf32, #tpu.memory_space<vmem>>, vector<16x1xf32>,
    %c0_24 = arith.constant 0 : index
    %c0_25 = arith.constant 0 : index
    %44 = vector.load %arg9[%c0_24, %c0_25] : memref<16x1xf32, #tpu.memory_space<vmem>>, vector<16x1xf32>
    tpu.vector_store %arg9[%c0_24, %c0_25], %32 {strides = array<i32>} : memref<16x1xf32, #tpu.memory_space<vmem>>, vector<16x1xf32>,
    %c0_26 = arith.constant 0 : index
    %c0_27 = arith.constant 0 : index
    %45 = vector.load %arg7[%c0_26, %c0_27] : memref<16x128xf32, #tpu.memory_space<vmem>>, vector<16x128xf32>
    tpu.vector_store %arg7[%c0_26, %c0_27], %25 {strides = array<i32>} : memref<16x128xf32, #tpu.memory_space<vmem>>, vector<16x128xf32>,
    %c1_i32 = arith.constant 1 : i32
    %46 = arith.cmpi eq, %arg1, %c1_i32 : i32
    %47 = arith.extui %46 : i1 to i32
    %c0_i32_28 = arith.constant 0 : i32
    %48 = arith.cmpi ne, %47, %c0_i32_28 : i32
    scf.if %48 {
      %c0_29 = arith.constant 0 : index
      %c0_30 = arith.constant 0 : index
      %49 = vector.load %arg9[%c0_29, %c0_30] : memref<16x1xf32, #tpu.memory_space<vmem>>, vector<16x1xf32>
      %c0_31 = arith.constant 0 : index
      %c0_32 = arith.constant 0 : index
      %50 = vector.load %arg10[%c0_31, %c0_32] : memref<16x1xf32, #tpu.memory_space<vmem>>, vector<16x1xf32>
      %51 = math.log %50 : vector<16x1xf32>
      %52 = arith.addf %49, %51 : vector<16x1xf32>
      %c0_33 = arith.constant 0 : index
      %c0_34 = arith.constant 0 : index
      %53 = vector.load %arg8[%c0_33, %c0_34] : memref<16x1xf32, #tpu.memory_space<vmem>>, vector<16x1xf32>
      tpu.vector_store %arg8[%c0_33, %c0_34], %52 {strides = array<i32>} : memref<16x1xf32, #tpu.memory_space<vmem>>, vector<16x1xf32>,
    } else {
    }
    return
  }
  func.func @transform_0(%arg0: i32, %arg1: i32) -> (i32, i32) {
    %c0_i32 = arith.constant 0 : i32
    %c0_i32_0 = arith.constant 0 : i32
    return %arg0, %c0_i32 : i32, i32
  }
  func.func @transform_1(%arg0: i32, %arg1: i32) -> (i32, i32) {
    %c0_i32 = arith.constant 0 : i32
    %c0_i32_0 = arith.constant 0 : i32
    return %c0_i32, %arg1 : i32, i32
  }
  func.func @transform_2(%arg0: i32, %arg1: i32) -> (i32, i32) {
    %c0_i32 = arith.constant 0 : i32
    %c0_i32_0 = arith.constant 0 : i32
    return %c0_i32, %arg1 : i32, i32
  }
  func.func @transform_3(%arg0: i32, %arg1: i32) -> (i32, i32) {
    %c0_i32 = arith.constant 0 : i32
    %c0_i32_0 = arith.constant 0 : i32
    return %c0_i32, %arg1 : i32, i32
  }
  func.func @transform_4(%arg0: i32, %arg1: i32) -> (i32, i32) {
    %c0_i32 = arith.constant 0 : i32
    %c0_i32_0 = arith.constant 0 : i32
    return %c0_i32, %arg1 : i32, i32
  }
  func.func @transform_5(%arg0: i32, %arg1: i32) -> (i32, i32) {
    %c0_i32 = arith.constant 0 : i32
    return %arg0, %arg1 : i32, i32
  }
  func.func @transform_6(%arg0: i32, %arg1: i32) -> (i32, i32) {
    %c0_i32 = arith.constant 0 : i32
    %c0_i32_0 = arith.constant 0 : i32
    return %arg0, %c0_i32 : i32, i32
  }
}

</mosaic_0001>

<bundles_post_ra>
// kernel: tpu_custom_call.1
= control target key start
LH: loop header
LB: loop body
LE: loop exit
PB: predicated region body
PF: predicated region fallthrough
CT: control target
= control target key end

     0   :  { %s1958_s0 = inlined_call_operand.hbm [shape: f32[32,32], index: 0, kind: input, shape index: {}]   ;;  %s1959_s1 = inlined_call_operand.hbm [shape: f32[8,256], index: 1, kind: input, shape index: {}]   ;;  %s1960_s2 = inlined_call_operand.hbm [shape: f32[32,256], index: 2, kind: input, shape index: {}]   ;;  %s1961_s3 = inlined_call_operand.vmem [shape: f32[1,256], index: 3, kind: input, shape index: {}]   ;;  %s1962_s4 = inlined_call_operand.hbm [shape: f32[32,256], index: 4, kind: input, shape index: {}]   ;;  %s1963_s5 = inlined_call_operand.hbm [shape: f32[32,256], index: 5, kind: output, shape index: {0}]   ;;  %s1964_s6 = inlined_call_operand.vmem [shape: f32[32,1], index: 6, kind: output, shape index: {1}]  }
   0x1   :  { %1986 = sst [smem:[#allocation33_spill]] %s1959_s1 }
   0x2   :  { %1987 = sst [smem:[#allocation34_spill]] %s1961_s3 }
   0x3   :  { %1988 = sst [smem:[#allocation35_spill]] %s1963_s5 }
   0x4   :  { %1989 = sst [smem:[#allocation36_spill]] %s1964_s6 }
   0x5   :  { %12 = vsyncpa [#allocation5], 0 }
   0x6   :  { %14 = vsyncpa [#allocation5 + $0x1], 0 }
   0x7   :  { %15 = vsyncpa [#allocation8], 0 }
   0x8   :  { %17 = vsyncpa [#allocation8 + $0x1], 0 }
   0x9   :  { %18 = vsyncpa [#allocation11], 0 }
   0xa   :  { %20 = vsyncpa [#allocation11 + $0x1], 0 }
   0xb   :  { %21 = vsyncpa [#allocation6], 0 }
   0xc   :  { %23 = vsyncpa [#allocation6 + $0x1], 0  ;;  %s1487_s21 = smov 0   ;;  %s1489_s22 = smov 0  }
   0xd   :  { %s1491_s23 = smov 0   ;;  %s1493_s24 = smov 0  }
   0xe   :  { %s1495_s25 = smov 0   ;;  %s1497_s26 = smov 0  }
   0xf   :  { %s1499_s27 = smov 0   ;;  %s1501_s28 = smov 0  }
  0x10   :  { %s1503_s29 = smov 0   ;;  %s1505_s30 = smov 0  }
  0x11   :  { %s1507_s7 = smov 0   ;;  %s1509_s8 = smov 0  }
  0x12   :  { %s1511_s9 = smov 0   ;;  %s1513_s10 = smov 0  }
  0x13 LB: > { %1990 = sst [smem:[#allocation17_spill]] %s1384_s21  ;;  %s1556_s11 = sadd.s32 4294967295, %s1436_s10   ;;  %s1436_s10 = sphi %s1513_s10, %s29_s10   ;;  %s1432_s9 = sphi %s1511_s9, %s2047_s9   ;;  %s1428_s8 = sphi %s1509_s8, %s2046_s8   ;;  %s1424_s7 = sphi %s1507_s7, %s2045_s7   ;;  %s1420_s30 = sphi %s1505_s30, %s2054_s30   ;;  %s1416_s29 = sphi %s1503_s29, %s2043_s29   ;;  %s1412_s28 = sphi %s1501_s28, %s2053_s28   ;;  %s1408_s27 = sphi %s1499_s27, %s2052_s27   ;;  %s1404_s26 = sphi %s1497_s26, %s2041_s26   ;;  %s1400_s25 = sphi %s1495_s25, %s2051_s25   ;;  %s1396_s24 = sphi %s1493_s24, %s2050_s24   ;;  %s1392_s23 = sphi %s1491_s23, %s2039_s23   ;;  %s1388_s22 = sphi %s1489_s22, %s2049_s22   ;;  %s1384_s21 = sphi %s1487_s21, %s2048_s21  }
  0x14   : > { %1991 = sst [smem:[#allocation18_spill]] %s1392_s23  ;;  %s38_s13 = sadd.s32 1, %s1428_s8 }
  0x15   : > { %1992 = sst [smem:[#allocation19_spill]] %s1404_s26  ;;  %s41_s14 = sadd.s32 1, %s1432_s9 }
  0x16   : > { %1993 = sst [smem:[#allocation20_spill]] %s1416_s29  ;;  %p39_p0 = scmp.ge.s32.totalorder %s38_s13, 2 }
  0x17   : > { %1994 = sst [smem:[#allocation21_spill]] %s1420_s30  ;;  %s48_s15 = sadd.s32 1, %s1416_s29 }
  0x18   : > { %1995 = sst [smem:[#allocation22_spill]] %s1424_s7  ;;  %p55_p1 = scmp.ne.s32.totalorder %s1416_s29, %s1412_s28 }
  0x19   : > { %1996 = sst [smem:[#allocation23_spill]] %s1428_s8  ;;  %p56_p2 = scmp.eq.s32.totalorder %s1436_s10, 0 }
  0x1a   : > { %1997 = sst [smem:[#allocation24_spill]] %s1432_s9  ;;  %s2056_s13 = smov (%p39_p0, %s38_s13), 0 }
  0x1b   : > { %1998 = sst [smem:[#allocation25_spill]] %s1436_s10  ;;  %s2058_s14 = smov (!%p39_p0, %s41_s14), %s1432_s9 }
  0x1c   : > { %1999 = sst [smem:[#allocation26_spill]] %s2056_s13  ;;  %p1570_p3 = por %p56_p2, %p55_p1 }
  0x1d   : > { %p61_p4 = scmp.ne.s32.totalorder %s1412_s28, %s1408_s27  ;;  %p43_p5 = scmp.ge.s32.totalorder %s2058_s14, 2 }
  0x1e   : > { %p62_p6 = scmp.eq.s32.totalorder %s1556_s11, 0  ;;  %s71_s17 = ssub.s32 %s1428_s8, %s2056_s13 }
  0x1f   : > { %s74_s18 = sadd.s32 1, %s1404_s26  ;;  %s2060_s14 = smov (%p43_p5, %s2058_s14), 0 }
  0x20   : > { %2001 = sst [smem:[#allocation27_spill]] %s2060_s14  ;;  %p1583_p7 = por %p62_p6, %p61_p4 }
  0x21   : > { %p72_p8 = scmp.eq.s32.totalorder %s71_s17, 0  ;;  %s45_s20 = ssub.s32 %s1432_s9, %s2060_s14 }
  0x22   : > { %s2002_s19 = scalar_select %p1583_p7, 1, 0 }
  0x23   : > { %p81_p9 = scmp.ne.s32.totalorder %s1404_s26, %s1400_s25  ;;  %p46_p10 = scmp.eq.s32.totalorder %s45_s20, 0 }
  0x24   : > { %p87_p11 = scmp.ne.s32.totalorder %s1400_s25, %s1396_s24  ;;  %s177_s5 = sor.u32 %s71_s17, %s45_s20 }
  0x25   : > { %s1594_s27 = scalar_select %p72_p8, %s1404_s26, %s74_s18  }
  0x26   : > { %s1597_s12 = scalar_select %p46_p10, %s1416_s29, %s48_s15  }
  0x27   : > { %2003 = sst [smem:[#allocation28_spill]] %s1594_s27  ;;  %p1601_p12 = por %p81_p9, %p56_p2 }
  0x28   : > { %2004 = sst [smem:[#allocation29_spill]] %s1597_s12  ;;  %p1607_p13 = por %p87_p11, %p62_p6 }
  0x29   : > { %s180_s24 = sadd.s32 1, %s1392_s23  ;;  %p178_p0 = scmp.eq.s32.totalorder %s177_s5, 0 }
  0x2a   : > { %s2006_s14 = scalar_select %p1607_p13, 1, 0 }
  0x2b   : > { %p190_p1 = scmp.ne.s32.totalorder %s1392_s23, %s1388_s22  ;;  %p191_p4 = scmp.eq.s32.totalorder %s1556_s11, 3 }
  0x2c   : > { %p196_p5 = scmp.ne.s32.totalorder %s1388_s22, %s1384_s21  ;;  %s2010_s12 = sadd.s32 4294967294, %s1436_s10  }
  0x2d   : > { %s1618_s15 = scalar_select %p178_p0, %s1392_s23, %s180_s24  }
  0x2e   : > { %p1620_p8 = por %p191_p4, %p190_p1  ;;  %p197_p2 = scmp.eq.s32.totalorder %s2010_s12, 3 }
  0x2f   : > { %2007 = sst [smem:[#allocation30_spill]] %s1618_s15  ;;  %p1017_p9 = scmp.lt.s32.totalorder %s1436_s10, 4 }
  0x30   : > { %s2008_s18 = scalar_select %p1620_p8, 1, 0 }
  0x31   : > { %p1627_p6 = por %p197_p2, %p196_p5  ;;  %s264_s17 = sand.u32 1, %s1436_s10  }
  0x32   : > { %2009 = sst [smem:[#allocation31_spill]] %s2008_s18  ;;  %p1634_p10 = pnand %p1017_p9, %p1570_p3 }
  0x33   : > { %s2011_s27 = scalar_select %p1627_p6, 1, 0 }
  0x34   : > { %s2013_s5 = scalar_select %p1634_p10, 1, 0 }
  0x35   : > { %2012 = sst [smem:[#allocation32_spill]] %s2011_s27  ;;  %s1639_s20 = sand.u32 1, %s1404_s26  }
  0x36   : > { %s1642_s24 = sshll.u32 %s1428_s8, 7  ;;  %s909_s15 = sshll.u32 %s1639_s20, 3 }
  0x37   : > { %s2014_s1 = sld [smem:[#allocation33_spill]]  ;;  %s268_s16 = scalar_lea.vmem [#allocation7], %s909_s15 }
  0x38   : > { %s275_s27 = sshll.u32 %s268_s16, 4  ;;  %p1653_p3 = pnand %p1017_p9, %p1601_p12  ;;  %s1657_s27 = int_to_ptr.vmem [resolvable:$true] %s275_s27 }
  0x39   : > { %s911_s8 = sshll.u32 %s1639_s20, 5  ;;  %s1660_s18 = scalar_lea.sflag [#allocation8], %s264_s17 }
  0x3a   : > { %s2015_s26 = scalar_select %p1653_p3, 1, 0 }
  0x3b   : > { %p1666_p0 = pneg %p1653_p3 }
  0x3d   : > { %s1649_s21 = scalar_lea.hbm %s2014_s1, %s1642_s24  ;;  %s1167_s16 = scalar_lea.hbm %s2014_s1, 256 }
  0x3e   : > { %s1162_s23 = scalar_lea.hbm %s1649_s21, 128  ;;  %p1168_p4 = scmp.lt.u32.totalorder %s1649_s21, %s2014_s1 }
  0x3f   : > { %p1163_p11 = scmp.ne.s32.totalorder %s1649_s21, %s1162_s23  ;;  %p1169_p5 = scmp.lt.u32.totalorder %s1167_s16, %s1162_s23 }
  0x40   : > { %p1171_p9 = scmp.lt.u32.totalorder %s1162_s23, %s1649_s21 }
  0x41   : > { %p1165_p1 = pnand %p1666_p0, %p1163_p11  ;;  %p1170_p2 = por %p1169_p5, %p1168_p4 }
  0x43   : > { %p1166_p12 = pneg %p1165_p1  ;;  %p1172_p6 = por %p1171_p9, %p1170_p2 }
  0x45   : > { %p1173_p8 = pnand %p1172_p6, %p1166_p12 }
  0x47   : > { %1176 = shalt.err (!%p1173_p8)
}
  0x48   : > { %s1177_s17 = scalar_lea.vmem %s1657_s27, 128  ;;  %s1438_s13 = smov [#allocation7]  }
  0x49   : > { %p1178_p11 = scmp.ne.s32.totalorder %s1657_s27, %s1177_s17  ;;  %s1182_s15 = sshll.u32 %s1438_s13, 4  ;;  %s1183_s15 = int_to_ptr.vmem [resolvable:$false] %s1182_s15 }
  0x4a   : > { %s1184_s3 = scalar_lea.vmem %s1183_s15, 256  ;;  %p1185_p7 = scmp.lt.s32.totalorder %s1657_s27, %s1183_s15 }
  0x4b   : > { %p1180_p1 = pnand %p1178_p11, %p1666_p0  ;;  %p1186_p10 = scmp.lt.s32.totalorder %s1184_s3, %s1177_s17 }
  0x4d   : > { %p1181_p13 = pneg %p1180_p1  ;;  %p1187_p4 = por %p1186_p10, %p1185_p7 }
  0x4f   : > { %p1188_p5 = pnand %p1187_p4, %p1181_p13 }
  0x51   : > { %1191 = shalt.err (!%p1188_p5)
}
  0x52   : > { %1006 = dma.hbm_to_vmem [thread:$0]  (!%p1653_p3), %s1649_s21, 128, %s1657_s27, %s1660_s18  }
  0x53   : > { %s1694_s16 = scalar_lea.hbm %s1960_s2, %s1642_s24  ;;  %s286_s17 = scalar_lea.vmem [#allocation9], %s911_s8 }
  0x54   : > { %s292_s13 = sshll.u32 %s286_s17, 4  ;;  %s1704_s1 = scalar_lea.hbm %s1962_s4, %s1642_s24  ;;  %s1698_s13 = int_to_ptr.vmem [resolvable:$true] %s292_s13 }
  0x55   : > { %s312_s6 = scalar_lea.vmem [#allocation10], %s911_s8  ;;  %p915_p7 = scmp.ge.s32.totalorder %s1436_s10, 1 }
  0x56   : > { %s318_s7 = sshll.u32 %s312_s6, 4  ;;  %p326_p13 = scmp.lt.s32.totalorder %s1436_s10, 5  ;;  %s1709_s7 = int_to_ptr.vmem [resolvable:$true] %s318_s7 }
  0x57   : > { %s243_s27 = sand.u32 1, %s1416_s29   ;;  %s938_s23 = sshll.u32 %s1432_s9, 8 }
  0x58   : > { %p1712_p8 = pnand %p915_p7, %p326_p13  ;;  %s906_s30 = sshll.u32 %s243_s27, 4 }
  0x59   : > { %s1721_s24 = scalar_lea.hbm %s1958_s0, %s938_s23  ;;  %s247_s6 = scalar_lea.vmem [#allocation4], %s906_s30 }
  0x5a   : > { %s2017_s21 = scalar_select %p1712_p8, 1, 0 }
  0x5b   : > { %s254_s8 = sshll.u32 %s247_s6, 4  ;;  %s1725_s3 = scalar_lea.sflag [#allocation5], %s243_s27  ;;  %s1723_s8 = int_to_ptr.vmem [resolvable:$true] %s254_s8 }
  0x5c   : > { %s1192_s10 = scalar_lea.hbm %s1721_s24, 256  ;;  %p2018_p10 = scmp.ne.s32.totalorder %s2013_s5, 0 }
  0x5d   : > { %p1193_p6 = scmp.ne.s32.totalorder %s1721_s24, %s1192_s10  ;;  %s1197_s15 = scalar_lea.hbm %s1958_s0, 512 }
  0x5e   : > { %p1194_p12 = pneg %p2018_p10  ;;  %p1198_p11 = scmp.lt.u32.totalorder %s1721_s24, %s1958_s0 }
  0x5f   : > { %p1199_p1 = scmp.lt.u32.totalorder %s1197_s15, %s1192_s10  ;;  %p1201_p5 = scmp.lt.u32.totalorder %s1192_s10, %s1721_s24 }
  0x60   : > { %p1195_p2 = pnand %p1194_p12, %p1193_p6 }
  0x61   : > { %p1200_p4 = por %p1199_p1, %p1198_p11 }
  0x62   : > { %p1196_p9 = pneg %p1195_p2 }
  0x63   : > { %p1202_p7 = por %p1201_p5, %p1200_p4 }
  0x65   : > { %p1203_p13 = pnand %p1202_p7, %p1196_p9 }
  0x67   : > { %1206 = shalt.err (!%p1203_p13)
}
  0x68   : > { %s1207_s27 = scalar_lea.vmem %s1723_s8, 256  ;;  %s1439_s30 = smov [#allocation4]  }
  0x69   : > { %p1208_p6 = scmp.ne.s32.totalorder %s1723_s8, %s1207_s27  ;;  %s1212_s6 = sshll.u32 %s1439_s30, 4  ;;  %s1213_s6 = int_to_ptr.vmem [resolvable:$false] %s1212_s6 }
  0x6a   : > { %s1214_s29 = scalar_lea.vmem %s1213_s6, 512  ;;  %p1215_p3 = scmp.lt.s32.totalorder %s1723_s8, %s1213_s6 }
  0x6b   : > { %p1210_p2 = pnand %p1208_p6, %p1194_p12  ;;  %p1216_p11 = scmp.lt.s32.totalorder %s1214_s29, %s1207_s27 }
  0x6d   : > { %p1211_p8 = pneg %p1210_p2  ;;  %p1217_p1 = por %p1216_p11, %p1215_p3 }
  0x6f   : > { %p1218_p4 = pnand %p1217_p1, %p1211_p8 }
  0x71   : > { %1221 = shalt.err (!%p1218_p4)
}
  0x72   : > { %s1440_s9 = smov 128   ;;  %s1441_s10 = smov 8  }
  0x73   : > { %1003 = dma.hbm_to_vmem [thread:$0]  (!%p2018_p10), %s1721_s24, 256, %s1723_s8, %s1725_s3, %s1440_s9, %s1440_s9, %s1441_s10  }
  0x74   : > { %s1222_s23 = scalar_lea.hbm %s1694_s16, 512  ;;  %s1227_s27 = scalar_lea.hbm %s1960_s2, 1024 }
  0x75   : > { %p1223_p3 = scmp.ne.s32.totalorder %s1694_s16, %s1222_s23  ;;  %p1228_p9 = scmp.lt.u32.totalorder %s1694_s16, %s1960_s2 }
  0x76   : > { %p1229_p5 = scmp.lt.u32.totalorder %s1227_s27, %s1222_s23  ;;  %p1231_p13 = scmp.lt.u32.totalorder %s1222_s23, %s1694_s16 }
  0x77   : > { %p1225_p8 = pnand %p1223_p3, %p1666_p0 }
  0x78   : > { %p1230_p7 = por %p1229_p5, %p1228_p9 }
  0x79   : > { %p1226_p12 = pneg %p1225_p8 }
  0x7a   : > { %p1232_p6 = por %p1231_p13, %p1230_p7 }
  0x7c   : > { %p1233_p2 = pnand %p1232_p6, %p1226_p12 }
  0x7e   : > { %1236 = shalt.err (!%p1233_p2)
}
  0x7f   : > { %s1237_s5 = scalar_lea.vmem %s1698_s13, 512  ;;  %s1442_s24 = smov [#allocation9]  }
  0x80   : > { %p1238_p10 = scmp.ne.s32.totalorder %s1698_s13, %s1237_s5  ;;  %s1242_s8 = sshll.u32 %s1442_s24, 4  ;;  %s1243_s8 = int_to_ptr.vmem [resolvable:$false] %s1242_s8 }
  0x81   : > { %s1244_s3 = scalar_lea.vmem %s1243_s8, 1024  ;;  %p1245_p4 = scmp.lt.s32.totalorder %s1698_s13, %s1243_s8 }
  0x82   : > { %p1240_p11 = pnand %p1238_p10, %p1666_p0  ;;  %p1246_p3 = scmp.lt.s32.totalorder %s1244_s3, %s1237_s5 }
  0x84   : > { %p1241_p1 = pneg %p1240_p11  ;;  %p1247_p8 = por %p1246_p3, %p1245_p4 }
  0x86   : > { %p1248_p9 = pnand %p1247_p8, %p1241_p1 }
  0x88   : > { %1251 = shalt.err (!%p1248_p9)
}
  0x89   : > { %s1443_s29 = smov 256   ;;  %p2019_p12 = scmp.ne.s32.totalorder %s2015_s26, 0 }
  0x8a   : > { %s309_s23 = scalar_lea.sflag [#allocation11], %s1639_s20  ;;  %s1252_s17 = scalar_lea.hbm %s1704_s1, 512 }
  0x8b   : > { %1009 = dma.hbm_to_vmem [thread:$0]  (!%p2019_p12), %s1694_s16, 512, %s1698_s13, %s1660_s18, %s1443_s29, %s1440_s9, %s1441_s10  }
  0x8c   : > { %p1253_p5 = scmp.ne.s32.totalorder %s1704_s1, %s1252_s17  ;;  %s1257_s30 = scalar_lea.hbm %s1962_s4, 1024 }
  0x8d   : > { %p1258_p6 = scmp.lt.u32.totalorder %s1704_s1, %s1962_s4  ;;  %p1259_p2 = scmp.lt.u32.totalorder %s1257_s30, %s1252_s17 }
  0x8e   : > { %p1255_p7 = pnand %p1253_p5, %p1666_p0  ;;  %p1261_p11 = scmp.lt.u32.totalorder %s1252_s17, %s1704_s1 }
  0x8f   : > { %p1260_p10 = por %p1259_p2, %p1258_p6 }
  0x90   : > { %p1256_p13 = pneg %p1255_p7 }
  0x91   : > { %p1262_p1 = por %p1261_p11, %p1260_p10 }
  0x93   : > { %p1263_p4 = pnand %p1262_p1, %p1256_p13 }
  0x95   : > { %1266 = shalt.err (!%p1263_p4)
}
  0x96   : > { %s1267_s18 = scalar_lea.vmem %s1709_s7, 512  ;;  %s1444_s16 = smov [#allocation10]  }
  0x97   : > { %p1268_p3 = scmp.ne.s32.totalorder %s1709_s7, %s1267_s18  ;;  %s1272_s13 = sshll.u32 %s1444_s16, 4  ;;  %s1273_s13 = int_to_ptr.vmem [resolvable:$false] %s1272_s13 }
  0x98   : > { %s1274_s24 = scalar_lea.vmem %s1273_s13, 1024  ;;  %p1275_p5 = scmp.lt.s32.totalorder %s1709_s7, %s1273_s13 }
  0x99   : > { %p1270_p8 = pnand %p1268_p3, %p1666_p0  ;;  %p1276_p7 = scmp.lt.s32.totalorder %s1274_s24, %s1267_s18 }
  0x9b   : > { %p1271_p9 = pneg %p1270_p8  ;;  %p1277_p6 = por %p1276_p7, %p1275_p5 }
  0x9d   : > { %p1278_p2 = pnand %p1277_p6, %p1271_p9 }
  0x9f   : > { %1281 = shalt.err (!%p1278_p2)
}
  0xa0   : > { %1012 = dma.hbm_to_vmem [thread:$0]  (!%p2019_p12), %s1704_s1, 512, %s1709_s7, %s309_s23, %s1443_s29, %s1440_s9, %s1441_s10  }
  0xa1   : > { %p2020_p0 = scmp.ne.s32.totalorder %s2017_s21, 0 }
  0xa2   : > { %s332_s12 = sand.u32 (!%p2020_p0), 1, %s1412_s28   ;;  %p2021_p13 = scmp.ne.s32.totalorder (!%p2020_p0), %s2002_s19, 0 }
  0xa3   : > { %330 = sbr.rel (%p2020_p0) target bundleno = 923 (0x39b), region = 40  ;;  %s1811_s8 = sshll.u32 (!%p2020_p0), %s332_s12, 4 }
  0xa4   : > { %s333_s3 = scalar_lea.sflag (!%p2020_p0), [#allocation5], %s332_s12  ;;  %s336_s17 = scalar_lea.vmem (!%p2020_p0), [#allocation4], %s1811_s8 }
  0xaa   : > { %1367 = dma.done.wait (%p2021_p13), %s333_s3, 256  }
  0xab   : > { %1369 = vsyncadd (%p2021_p13), %s333_s3, 4294967040  ;;  %s341_s1 = sand.u32 1, %s1556_s11   ;;  %s343_s26 = sand.u32 1, %s1400_s25  }
  0xac   : > { %s917_s7 = sshll.u32 %s343_s26, 3  ;;  %s342_s20 = scalar_lea.sflag [#allocation8], %s341_s1 }
  0xad   : > { %s1820_s21 = scalar_lea.vmem [#allocation7], %s917_s7  ;;  %p2022_p12 = scmp.ne.s32.totalorder %s2006_s14, 0 }
  0xaf   : > { %1371 = dma.done.wait (%p2022_p12), %s342_s20, 640  }
  0xb0   : > { %1373 = vsyncadd (%p2022_p12), %s342_s20, 4294966656  ;;  %s918_s9 = sshll.u32 %s343_s26, 5  ;;  %s360_s29 = scalar_lea.sflag [#allocation11], %s343_s26 }
  0xb1   : > { %s354_s10 = scalar_lea.vmem [#allocation9], %s918_s9  ;;  %s363_s19 = scalar_lea.vmem [#allocation10], %s918_s9 }
  0xb2   : > { %1375 = dma.done.wait (%p2022_p12), %s360_s29, 512  }
  0xb3   : > { %1377 = vsyncadd (%p2022_p12), %s360_s29, 4294966784  ;;  %s2023_s11 = sld [smem:[#allocation22_spill]]  ;;  %s405_s23 = sand.u32 1, %s1388_s22   ;;  %vm439_vm0 = vcmask 261120   ;;  %v521_v0 = vld [vmem:[%s363_s19] sm:$0xff]  ;;  %v522_v1 = vld [vmem:[%s363_s19 + $0x8] sm:$0xff] }
  0xb4   : > { %s1834_s27 = sshll.u32 %s405_s23, 4  ;;  %s2024_s18 = sld [smem:[#allocation36_spill]]  ;;  %v523_v2 = vld [vmem:[%s363_s19 + $0x10] sm:$0xff]  ;;  %v982_v3 = vpack.c.bf16 %v522_v1, %v521_v0  ;;  %v524_v4 = vld [vmem:[%s363_s19 + $0x18] sm:$0xff]  ;;  %v428_v7 = vld [vmem:[%s354_s10] sm:$0xff] }
  0xb5   : > { %v426_v5 = vld [vmem:[%s336_s17] sm:$0xff]  ;;  %v986_v6 = vpack.c.bf16 %v524_v4, %v523_v2  ;;  %v429_v8 = vld [vmem:[%s354_s10 + $0x8] sm:$0xff]  ;;  %v431_v11 = vld [vmem:[%s354_s10 + $0x18] sm:$0xff]  ;;  %s2025_s14 = sld [smem:[#allocation21_spill]]  ;;  %s2026_s8 = sld [smem:[#allocation34_spill]] }
  0xb6   : > { %971 = vmatprep.mubr.msk.f32.mxu1 %vm439_vm0, %v426_v5  ;;  %v430_v9 = vld [vmem:[%s354_s10 + $0x10] sm:$0xff]  ;;  %960 = vmatprep.mubr.msk.f32.mxu0 %vm439_vm0, %v426_v5  ;;  %v974_v10 = vpack.c.bf16 %v429_v8, %v428_v7  ;;  %v427_v13 = vld [vmem:[%s336_s17 + $0x8] sm:$0xff]  ;;  %s1856_s17 = scalar_lea.vmem [#allocation12], %s1834_s27 }
  0xb7   : > { %983 = vmatprep.subr.bf16.mxu1 %v982_v3  ;;  %v978_v12 = vpack.c.bf16 %v431_v11, %v430_v9  ;;  %v600_v14 = vld [vmem:[%s1820_s21] sm:$0xff] }
  0xb8   : > { %985 = vmatpush3.bf16.msra.mxu1 %v982_v3  ;;  %975 = vmatprep.subr.bf16.mxu0 %v974_v10 }
  0xb9   : > { %s921_s15 = sshll.u32 %s2023_s11, 1  ;;  %987 = vmatprep.subr.bf16.mxu1 %v986_v6  ;;  %977 = vmatpush3.bf16.msra.mxu0 %v974_v10 }
  0xba   : > { %p421_p10 = scmp.lt.s32.totalorder %s921_s15, 3  ;;  %979 = vmatprep.subr.bf16.mxu0 %v978_v12 }
  0xbb   : > { %p416_p11 = scmp.lt.s32.totalorder %s2025_s14, 1  ;;  %p930_p1 = scmp.ne.s32.totalorder %s2025_s14, 0 }
  0xbc   : > { %s2062_s15 = smov (!%p421_p10, %s921_s15), 3  ;;  %989 = vmatpush3.bf16.msra.mxu1 %v986_v6  ;;  %vm623_vm1 = vcmask (!%p930_p1), 7168   ;;  %v1445_v34 = vmov (!%p930_p1), -inf   ;;  %v1446_v35 = vmov (!%p930_p1), 0.0  }
  0xbd   : > { %s922_s30 = sshll.u32 %s2062_s15, 3  ;;  %981 = vmatpush3.bf16.msra.mxu0 %v978_v12  ;;  %624 = vst.msk [vmem:[#allocation2] sm:$0xff] (!%p930_p1), %vm623_vm1, %v1445_v34  ;;  %625 = vst.msk [vmem:[#allocation2 + $0x8] sm:$0xff] (!%p930_p1), %vm623_vm1, %v1445_v34 }
  0xbe   : > { %s1839_s16 = scalar_lea.vmem %s2024_s18, %s922_s30  ;;  %626 = vst.msk [vmem:[#allocation3] sm:$0xff] (!%p930_p1), %vm623_vm1, %v1446_v35  ;;  %627 = vst.msk [vmem:[#allocation3 + $0x8] sm:$0xff] (!%p930_p1), %vm623_vm1, %v1446_v35 }
  0xbf   : > { %972 = vmatmul.mubr.msk.f32.vlgmr.msra.gmra.mrb[0].mxu1 %vm439_vm0, %v427_v13  ;;  %s417_s13 = scalar_select %p416_p11, %s2025_s14, 1 }
  0xc0   : > { %961 = vmatmul.mubr.msk.f32.vlgmr.msra.gmra.mrb[0].mxu0 %vm439_vm0, %v427_v13 }
  0xc1   : > { %s418_s3 = scalar_lea.vmem %s2026_s8, %s417_s13 }
  0xc2   : > { %v923_v27 = vld [vmem:[%s418_s3] ss:$0 sm:$0xff] }
 0x192   : > { %v973_v15 = vpop.f32.mrb[0].mxu1 }
 0x193   : > { %v602_v16 = vadd.f32 %v973_v15, %v600_v14  ;;  %v591_v17 = vpop.f32.mrb[1].mxu1  ;;  %v962_v19 = vpop.f32.mrb[0].mxu0 }
 0x194   : > { %v601_v18 = vadd.f32 %v600_v14, %v591_v17  ;;  %v512_v21 = vpop.f32.mrb[1].mxu0  ;;  %v518_v28 = vadd.f32 %v962_v19, %v923_v27 }
 0x195   : > { %v929_v20 = vmul.f32 -1.442695, %v602_v16  ;;  %v513_v29 = vadd.f32 %v923_v27, %v512_v21 }
 0x196   : > { %v928_v22 = vmul.f32 -1.442695, %v601_v18 }
 0x197   : > { %1140 = vpow2.f32 %v929_v20 }
 0x198   : > { %1142 = vpow2.f32 %v928_v22 }
 0x1a1   : > { %v1141_v23 = vpop.eup %1140 }
 0x1a2   : > { %v1143_v24 = vpop.eup %1142  ;;  %v610_v25 = vadd.f32 1.0, %v1141_v23 }
 0x1a3   : > { %v609_v26 = vadd.f32 1.0, %v1143_v24 }
 0x1a4   : > { %1144 = vrcp.f32 %v610_v25 }
 0x1a5   : > { %1146 = vrcp.f32 %v609_v26 }
 0x1aa   : > { %622 = sbr.rel (%p930_p1) target bundleno = 433 (0x1b1), region = 60 }
 0x1ae   : > { %v1145_v30 = vpop.eup %1144 }
 0x1af   : > { %v1147_v31 = vpop.eup %1146  ;;  %v618_v32 = vmul.f32 %v1145_v30, %v518_v28 }
 0x1b0   : > { %v617_v33 = vmul.f32 %v1147_v31, %v513_v29 }
 0x1b1 PF: > { %674 = vst [vmem:[%s1856_s17 + $0x8] sm:$0xff] %v618_v32  ;;  %v1447_v36 = vmov 0   ;;  %v628_v37 = vld [vmem:[#allocation2] sm:$0xff]  ;;  %vm668_vm2 = vcmask 7168   ;;  %v629_v40 = vld [vmem:[#allocation2 + $0x8] sm:$0xff]  ;;  %v636_v56 = vld [vmem:[#allocation3] sm:$0xff] }
 0x1b2   : > { %630 = vmax.xlane.f32.xlu0 %v617_v33  ;;  %673 = vst [vmem:[%s1856_s17] sm:$0xff] %v617_v33  ;;  %1148 = vset.pattern.permute.xlu1 %v1447_v36  ;;  %v637_v60 = vld [vmem:[#allocation3 + $0x8] sm:$0xff]  ;;  %s2027_s1 = sld [smem:[#allocation21_spill]] }
 0x1b3   : > { %1149 = vset.pattern.permute.xlu0 %v1447_v36 }
 0x1b6   : > { %632 = vmax.xlane.f32.xlu0 %v618_v32 }
 0x1b8   : > { %p931_p4 = scmp.ne.s32.totalorder %s2027_s1, 1 }
 0x23f   : > { %v631_v38 = vpop.xlane.xlu0 %630 }
 0x240   : > { %v634_v39 = vmax.f32 %v628_v37, %v631_v38 }
 0x242   : > { %v638_v41 = vsub.f32 %v628_v37, %v634_v39  ;;  %671 = vst.msk [vmem:[#allocation2] sm:$0xff] %vm668_vm2, %v634_v39  ;;  %648 = vperm.xlu1 %1148, %v634_v39  }
 0x243   : > { %v633_v42 = vpop.xlane.xlu0 %632 }
 0x244   : > { %v635_v43 = vmax.f32 %v629_v40, %v633_v42  ;;  %v640_v53 = vmul.f32 1.442695, %v638_v41 }
 0x246   : > { %v639_v44 = vsub.f32 %v629_v40, %v635_v43  ;;  %672 = vst.msk [vmem:[#allocation2 + $0x8] sm:$0xff] %vm668_vm2, %v635_v43  ;;  %653 = vperm.xlu1 %1148, %v635_v43  }
 0x248   : > { %v642_v54 = vmul.f32 1.442695, %v639_v44 }
 0x249   : > { %v679_v4 = vld [vmem:[#allocation2] sm:$0xff] (!%p931_p4) }
 0x24d   : > { %v680_v7 = vld [vmem:[#allocation2 + $0x8] sm:$0xff] (!%p931_p4) }
 0x2c1   : > { %v649_v45 = vpop.permute.xlu1 %648 }
 0x2c2   : > { %v656_v46 = vsub.f32 %v617_v33, %v649_v45 }
 0x2c4   : > { %v658_v47 = vmul.f32 1.442695, %v656_v46 }
 0x2c5   : > { %v654_v48 = vpop.permute.xlu1 %653 }
 0x2c6   : > { %1150 = vpow2.f32 %v658_v47  ;;  %v657_v49 = vsub.f32 %v618_v32, %v654_v48 }
 0x2c8   : > { %v660_v50 = vmul.f32 1.442695, %v657_v49 }
 0x2ca   : > { %1152 = vpow2.f32 %v660_v50 }
 0x2cb   : > { %1154 = vpow2.f32 %v640_v53 }
 0x2cc   : > { %1156 = vpow2.f32 %v642_v54 }
 0x2d0   : > { %v1151_v51 = vpop.eup %1150 }
 0x2d1   : > { %662 = vadd.xlane.f32.xlu0 %v1151_v51 }
 0x2d4   : > { %v1153_v52 = vpop.eup %1152 }
 0x2d5   : > { %664 = vadd.xlane.f32.xlu1 %v1153_v52  ;;  %v1155_v55 = vpop.eup %1154 }
 0x2d6   : > { %v644_v57 = vmul.f32 %v1155_v55, %v636_v56  ;;  %v1157_v58 = vpop.eup %1156 }
 0x2d7   : > { %v645_v62 = vmul.f32 %v1157_v58, %v637_v60 }
 0x35e   : > { %v663_v59 = vpop.xlane.xlu0 %662 }
 0x35f   : > { %v666_v61 = vadd.f32 %v663_v59, %v644_v57  ;;  %678 = sbr.rel (%p931_p4) target bundleno = 893 (0x37d), region = 64 }
 0x361   : > { %669 = vst.msk [vmem:[#allocation3] sm:$0xff] %vm668_vm2, %v666_v61 }
 0x362   : > { %v665_v63 = vpop.xlane.xlu1 %664 }
 0x363   : > { %v667_v0 = vadd.f32 %v665_v63, %v645_v62 }
 0x365   : > { %670 = vst.msk [vmem:[#allocation3 + $0x8] sm:$0xff] %vm668_vm2, %v667_v0 }
 0x368   : > { %v681_v1 = vld [vmem:[#allocation3] sm:$0xff] }
 0x369   : > { %1158 = vlog2.f32 %v681_v1 }
 0x36c   : > { %v682_v2 = vld [vmem:[#allocation3 + $0x8] sm:$0xff] }
 0x36d   : > { %1160 = vlog2.f32 %v682_v2 }
 0x373   : > { %v1159_v3 = vpop.eup %1158 }
 0x374   : > { %v684_v6 = vmul.f32 0.6931472, %v1159_v3 }
 0x376   : > { %v687_v9 = vadd.f32 %v684_v6, %v679_v4 }
 0x377   : > { %v1161_v5 = vpop.eup %1160 }
 0x378   : > { %v686_v8 = vmul.f32 0.6931472, %v1161_v5  ;;  %689 = vst.msk [vmem:[%s1839_s16] sm:$0xff] %vm668_vm2, %v687_v9 }
 0x37a   : > { %v688_v10 = vadd.f32 %v686_v8, %v680_v7 }
 0x37c   : > { %690 = vst.msk [vmem:[%s1839_s16 + $0x8] sm:$0xff] %vm668_vm2, %v688_v10 }
 0x37d PF: > { %s2028_s26 = sld [smem:[#allocation22_spill]]  ;;  %s2029_s7 = sld [smem:[#allocation21_spill]] }
 0x37e   : > { %s2030_s20 = sld [smem:[#allocation31_spill]]  ;;  %s712_s10 = sshll.u32 %s1856_s17, 4  ;;  %s1873_s10 = int_to_ptr.vmem [resolvable:$true] %s712_s10 }
 0x37f   : > { %s2031_s15 = sld [smem:[#allocation35_spill]]  ;;  %s1882_s30 = scalar_lea.sflag [#allocation6], %s405_s23 }
 0x380   : > { %s1282_s6 = scalar_lea.vmem %s1873_s10, 256  ;;  %s1448_s5 = smov [#allocation12]  }
 0x381   : > { %p1283_p3 = scmp.ne.s32.totalorder %s1873_s10, %s1282_s6  ;;  %s1286_s18 = sshll.u32 %s1448_s5, 4  ;;  %s1287_s18 = int_to_ptr.vmem [resolvable:$false] %s1286_s18 }
 0x382   : > { %s1288_s16 = scalar_lea.vmem %s1287_s18, 512  ;;  %p1289_p7 = scmp.lt.s32.totalorder %s1873_s10, %s1287_s18 }
 0x383   : > { %s939_s21 = sshll.u32 %s2028_s26, 2  ;;  %p1290_p6 = scmp.lt.s32.totalorder %s1288_s16, %s1282_s6 }
 0x384   : > { %s709_s9 = sadd.s32 %s2029_s7, %s939_s21  ;;  %p2032_p8 = scmp.ne.s32.totalorder %s2030_s20, 0 }
 0x385   : > { %s935_s29 = sshll.u32 %s709_s9, 7  ;;  %p1291_p2 = por %p1290_p6, %p1289_p7 }
 0x386   : > { %s1878_s27 = scalar_lea.hbm %s2031_s15, %s935_s29  ;;  %p1284_p9 = pnand %p1283_p3, %p2032_p8 }
 0x388   : > { %p1285_p5 = pneg %p1284_p9 }
 0x38a   : > { %p1292_p0 = pnand %p1291_p2, %p1285_p5 }
 0x38c   : > { %1295 = shalt.err (!%p1292_p0)
}
 0x38d   : > { %s1296_s23 = scalar_lea.hbm %s1878_s27, 256  ;;  %s1300_s24 = scalar_lea.hbm %s2031_s15, 1024 }
 0x38e   : > { %p1297_p13 = scmp.ne.s32.totalorder %s1878_s27, %s1296_s23  ;;  %p1301_p11 = scmp.lt.u32.totalorder %s1878_s27, %s2031_s15 }
 0x38f   : > { %p1302_p1 = scmp.lt.u32.totalorder %s1300_s24, %s1296_s23  ;;  %p1304_p3 = scmp.lt.u32.totalorder %s1296_s23, %s1878_s27 }
 0x390   : > { %p1298_p12 = pnand %p1297_p13, %p2032_p8 }
 0x391   : > { %p1303_p4 = por %p1302_p1, %p1301_p11 }
 0x392   : > { %p1299_p10 = pneg %p1298_p12 }
 0x393   : > { %p1305_p9 = por %p1304_p3, %p1303_p4 }
 0x395   : > { %p1306_p5 = pnand %p1305_p9, %p1299_p10 }
 0x397   : > { %1309 = shalt.err (!%p1306_p5)
}
 0x398   : > { %s1449_s3 = smov 128   ;;  %s1450_s17 = smov 256  }
 0x399   : > { %s1451_s1 = smov 8  }
 0x39a   : > { %998 = dma.vmem_to_hbm [thread:$0]  (%p2032_p8), %s1873_s10, 256, %s1878_s27, %s1882_s30, %s1449_s3, %s1450_s17, %s1451_s1  }
 0x39b PF: > { %s2033_s26 = sld [smem:[#allocation25_spill]]  ;;  %s2034_s7 = sld [smem:[#allocation17_spill]] }
 0x39c   : > { %s2035_s21 = sld [smem:[#allocation32_spill]] }
 0x3a1   : > { %p1018_p7 = scmp.ge.s32.totalorder %s2033_s26, 2  ;;  %s731_s9 = sand.u32 1, %s2034_s7  }
 0x3a2   : > { %p2036_p6 = scmp.ne.s32.totalorder %s2035_s21, 0  ;;  %s732_s29 = scalar_lea.sflag [#allocation6], %s731_s9 }
 0x3a4   : > { %p1014_p2 = pnand %p1018_p7, %p2036_p6 }
 0x3a6   : > { %1379 = dma.done.wait (!%p1014_p2), %s732_s29, 256  }
 0x3a7   : > { %1381 = vsyncadd (!%p1014_p2), %s732_s29, 4294967040  ;;  %s29_s10 = sadd.s32 1, %s2033_s26   ;;  %s2038_s20 = sld [smem:[#allocation18_spill]] }
 0x3a8   : > { %p1911_p0 = scmp.ge.s32.totalorder %s29_s10, 6   ;;  %s2039_s23 = sld [smem:[#allocation30_spill]] }
 0x3a9   : > { %s2040_s11 = sld [smem:[#allocation19_spill]]  ;;  %s2041_s26 = sld [smem:[#allocation28_spill]] }
 0x3aa   : > { %s2042_s30 = sld [smem:[#allocation20_spill]]  ;;  %s2043_s29 = sld [smem:[#allocation29_spill]] }
 0x3ab   : > { %s2044_s6 = sld [smem:[#allocation23_spill]]  ;;  %s2045_s7 = sld [smem:[#allocation24_spill]] }
 0x3ac   : > { %s2046_s8 = sld [smem:[#allocation26_spill]]  ;;  %s2047_s9 = sld [smem:[#allocation27_spill]] }
 0x3ad   : > { %s2048_s21 = smov %s1388_s22  ;;  %s2049_s22 = smov %s2038_s20 }
 0x3ae   : > { %s2050_s24 = smov %s1400_s25  ;;  %s2052_s27 = smov %s1412_s28 }
 0x3af   : > { %s2051_s25 = smov %s2040_s11  ;;  %28 = sbr.rel (!%p1911_p0) target bundleno = 19 (0x13), region = 145 }
 0x3b0   : > { %s2053_s28 = smov %s2042_s30 }
 0x3b1   : > { %s2054_s30 = smov %s2044_s6 }
 0x3b6   :  { %745 = vsyncpa [#allocation5], 1 }
 0x3b7   :  { %747 = vsyncpa [#allocation5 + $0x1], 1 }
 0x3b8   :  { %748 = vsyncpa [#allocation8], 1 }
 0x3b9   :  { %750 = vsyncpa [#allocation8 + $0x1], 1 }
 0x3ba   :  { %751 = vsyncpa [#allocation11], 1 }
 0x3bb   :  { %753 = vsyncpa [#allocation11 + $0x1], 1 }
 0x3bc   :  { %754 = vsyncpa [#allocation6], 1 }
 0x3bd   :  { %756 = vsyncpa [#allocation6 + $0x1], 1 }

</bundles_post_ra>
